<compile_context>
chip_gen: v7x
topology: tpu7x:2x2x1
jax: 0.10.0
libtpu: 0.0.40
codegen_flags: <defaults>
</compile_context>

<pallas_src>
import functools

import jax
import jax.numpy as jnp
from jax.experimental import pallas as pl
from jax.experimental.pallas import tpu as pltpu


def _round_up(n, m):
    return ((n + m - 1) // m) * m


def _default_act_dtype():
    """bf16 ReLU on v6e/v7x (bf16 VPU lanes -> half the vregs); f32 elsewhere."""
    try:
        kind = jax.devices()[0].device_kind.lower()
    except Exception:
        kind = ""
    return jnp.bfloat16 if ("v6" in kind or "v7" in kind) else jnp.float32


def qnetwork_kernel(x_ref,
                    w1_ref, b1_ref,
                    w2_ref, b2_ref,
                    w3_ref, b3_ref,
                    w4_ref, b4_ref,
                    o_ref, *, act_dtype):
    """One batch tile of the fused MLP. Matmuls on the MXU (bf16 in, f32 acc),
    bias-add in f32, ReLU in `act_dtype` (bf16 on v6e/v7x, f32 on v5-class)."""

    def layer(h_bf16, w_ref, b_ref):
        y = jnp.dot(h_bf16, w_ref[...], preferred_element_type=jnp.float32) + b_ref[...]
        # ReLU commutes with the downcast; doing it post-cast halves live vregs
        # when act_dtype is bf16. Final .astype is a no-op if already bf16.
        return jnp.maximum(y.astype(act_dtype), 0).astype(jnp.bfloat16)

    h = x_ref[...].astype(jnp.bfloat16)
    h = layer(h, w1_ref, b1_ref)
    h = layer(h, w2_ref, b2_ref)
    h = layer(h, w3_ref, b3_ref)
    out = jnp.dot(h, w4_ref[...], preferred_element_type=jnp.float32) + b4_ref[...]
    o_ref[...] = out.astype(o_ref.dtype)


@functools.partial(jax.jit, static_argnames=("out_dim", "tm"))
def qnetwork_forward(x, params, *, out_dim, tm=256):
    """x: [B, input_dim] f32. params: w{i} bf16 [in,out], b{i} f32 [1,out], with
    w4/b4 pre-padded to a 128-wide (lane-dense) output. Returns [B, out_dim] f32."""
    B, input_dim = x.shape
    out_pad = params["w4"].shape[1]          # lane-dense width, padded at init.

    # --- rows: pad only to a multiple of 8 (tiny, and only for ragged B). ---
    rows = _round_up(B, 8)
    if rows != B:
        x = jnp.pad(x, ((0, rows - B), (0, 0)))

    # --- batch tile: multiple of 8; cap so there are >= 2 tiles once rows >= 16
    #     (v7x has 2 TensorCores; "parallel" grid axis splits the batch). ---
    cap = _round_up(rows // 2, 8) if rows >= 16 else rows
    tm_eff = max(8, min(tm, cap))
    grid = (pl.cdiv(rows, tm_eff),)

    args = (x,
            params["w1"], params["b1"],
            params["w2"], params["b2"],
            params["w3"], params["b3"],
            params["w4"], params["b4"])

    # x / out are tiled over the batch grid; weights & biases are grid-invariant
    # (block index fixed at (0,0)) -> VMEM-resident, single-buffered.
    in_specs = [pl.BlockSpec((tm_eff, input_dim), lambda i: (i, 0))]
    for a in args[1:]:
        in_specs.append(pl.BlockSpec(a.shape, lambda i: (0, 0),
                                     pipeline_mode=pl.Buffered(1)))
    out_spec = pl.BlockSpec((tm_eff, out_pad), lambda i: (i, 0))

    # Advisory cost estimate from the actual layer widths.
    widths = [input_dim] + [params[f"w{i}"].shape[1] for i in (1, 2, 3, 4)]
    flops = 2 * rows * sum(widths[i] * widths[i + 1] for i in range(4))
    bytes_accessed = (int(x.size) * x.dtype.itemsize + rows * out_pad * 4 +
                      sum(int(a.size) * a.dtype.itemsize for a in args[1:]))
    cost = pl.CostEstimate(flops=flops, transcendentals=0,
                           bytes_accessed=bytes_accessed)

    out = pl.pallas_call(
        functools.partial(qnetwork_kernel, act_dtype=_default_act_dtype()),
        out_shape=jax.ShapeDtypeStruct((rows, out_pad), jnp.float32),
        grid_spec=pltpu.PrefetchScalarGridSpec(
            num_scalar_prefetch=0,
            grid=grid,
            in_specs=in_specs,
            out_specs=out_spec,
        ),
        compiler_params=pltpu.CompilerParams(
            dimension_semantics=("parallel",)),
        cost_estimate=cost,
    )(*args)

    # Padded rows / lanes are sliced off here (they were never meaningful).
    # For very large eval batches the padded [rows, 128] f32 output is write-
    # amplified ~32x vs out_dim=4; a transposed [8, rows] output layout would
    # remove that if that regime ever matters.
    return out[:B, :out_dim]


def init_qnetwork_params(key, input_dim, output_dim, out_pad=128):
    """Deterministic init mirroring the PyTorch module:
       kaiming_uniform_(nonlinearity='relu') -> U(-sqrt(6/fan_in), +sqrt(6/fan_in)),
       bias ~ U(-0.01, 0.01).
       Weights stored as [in, out] bf16 (transposed vs torch [out, in]); biases
       stored as [1, out] f32. The final layer is pre-padded to `out_pad` columns
       (multiple of 128) so the kernel output stays lane-dense with zero per-call
       padding work."""
    out_pad = _round_up(max(output_dim, out_pad), 128)
    dims = [(input_dim, 256), (256, 128), (128, 64), (64, output_dim)]
    params = {}
    for i, (fan_in, fan_out) in enumerate(dims, start=1):
        key, kw, kb = jax.random.split(key, 3)
        bound = (6.0 / fan_in) ** 0.5        # gain(relu) * sqrt(3 / fan_in)
        w = jax.random.uniform(kw, (fan_in, fan_out), jnp.float32,
                               minval=-bound, maxval=bound)
        b = jax.random.uniform(kb, (fan_out,), jnp.float32,
                               minval=-0.01, maxval=0.01)
        if i == 4:
            w = jnp.zeros((fan_in, out_pad), jnp.float32).at[:, :fan_out].set(w)
            b = jnp.zeros((out_pad,), jnp.float32).at[:fan_out].set(b)
        params[f"w{i}"] = w.astype(jnp.bfloat16)
        params[f"b{i}"] = b.reshape(1, -1)
    return params


if __name__ == "__main__":
    key = jax.random.PRNGKey(0)
    input_dim = 8      # e.g. state dimension of the RL environment
    output_dim = 4     # e.g. number of discrete actions
    batch = 2

    key, kx = jax.random.split(key)
    x = jax.random.normal(kx, (batch, input_dim), jnp.float32)

    params = init_qnetwork_params(key, input_dim, output_dim)

    out = qnetwork_forward(x, params, out_dim=output_dim)
    jax.block_until_ready(out)

    # Pure-JAX reference with identical numerics (same bf16 weights, f32 accumulate).
    act_dtype = _default_act_dtype()
    h = x.astype(jnp.bfloat16)
    y = None
    for i in range(1, 5):
        y = jnp.dot(h, params[f"w{i}"],
                    preferred_element_type=jnp.float32) + params[f"b{i}"]
        if i < 4:
            h = jnp.maximum(y.astype(act_dtype), 0).astype(jnp.bfloat16)
    ref = y[:, :output_dim]

    assert out.shape == (batch, output_dim), out.shape
    assert bool(jnp.allclose(out, ref, atol=1e-2, rtol=1e-2)), (out, ref)

    print("KERNEL_OK")
</pallas_src>

<mosaic_0001>
module attributes {stable_mosaic.version = 11 : i64} {
  func.func @qnetwork_kernel(%arg0: i32, %arg1: memref<8x8xf32, #tpu.memory_space<vmem>>, %arg2: memref<8x256xbf16, #tpu.memory_space<vmem>>, %arg3: memref<1x256xf32, #tpu.memory_space<vmem>>, %arg4: memref<256x128xbf16, #tpu.memory_space<vmem>>, %arg5: memref<1x128xf32, #tpu.memory_space<vmem>>, %arg6: memref<128x64xbf16, #tpu.memory_space<vmem>>, %arg7: memref<1x64xf32, #tpu.memory_space<vmem>>, %arg8: memref<64x128xbf16, #tpu.memory_space<vmem>>, %arg9: memref<1x128xf32, #tpu.memory_space<vmem>>, %arg10: memref<8x128xf32, #tpu.memory_space<vmem>>) attributes {dimension_semantics = [#tpu.dimension_semantics<parallel>], iteration_bounds = array<i64: 1>, scalar_prefetch = 0 : i64, scratch_operands = 0 : i64, tpu.core_type = #tpu.core_type<tc>, window_params = [{transform_indices = @transform_0, window_bounds = array<i64: 8, 8>}, {pipeline_mode = #tpu.pipeline_mode<synchronous>, transform_indices = @transform_1, window_bounds = array<i64: 8, 256>}, {pipeline_mode = #tpu.pipeline_mode<synchronous>, transform_indices = @transform_2, window_bounds = array<i64: 1, 256>}, {pipeline_mode = #tpu.pipeline_mode<synchronous>, transform_indices = @transform_3, window_bounds = array<i64: 256, 128>}, {pipeline_mode = #tpu.pipeline_mode<synchronous>, transform_indices = @transform_4, window_bounds = array<i64: 1, 128>}, {pipeline_mode = #tpu.pipeline_mode<synchronous>, transform_indices = @transform_5, window_bounds = array<i64: 128, 64>}, {pipeline_mode = #tpu.pipeline_mode<synchronous>, transform_indices = @transform_6, window_bounds = array<i64: 1, 64>}, {pipeline_mode = #tpu.pipeline_mode<synchronous>, transform_indices = @transform_7, window_bounds = array<i64: 64, 128>}, {pipeline_mode = #tpu.pipeline_mode<synchronous>, transform_indices = @transform_8, window_bounds = array<i64: 1, 128>}, {transform_indices = @transform_9, window_bounds = array<i64: 8, 128>}]} {
    %c0 = arith.constant 0 : index
    %c0_0 = arith.constant 0 : index
    %0 = vector.load %arg1[%c0, %c0_0] : memref<8x8xf32, #tpu.memory_space<vmem>>, vector<8x8xf32>
    %1 = arith.truncf %0 : vector<8x8xf32> to vector<8x8xbf16>
    %c0_1 = arith.constant 0 : index
    %c0_2 = arith.constant 0 : index
    %2 = vector.load %arg2[%c0_1, %c0_2] : memref<8x256xbf16, #tpu.memory_space<vmem>>, vector<8x256xbf16>
    %cst = arith.constant dense<0.000000e+00> : vector<8x256xf32>
    %3 = tpu.matmul %1, %2, %cst {dimension_numbers = #tpu.dot_dimension_numbers<[1], [0], [0], [1], [0, 0, 1, 1], [], []>} : vector<8x8xbf16>, vector<8x256xbf16>, vector<8x256xf32> -> vector<8x256xf32>
    %c0_3 = arith.constant 0 : index
    %c0_4 = arith.constant 0 : index
    %4 = vector.load %arg3[%c0_3, %c0_4] : memref<1x256xf32, #tpu.memory_space<vmem>>, vector<1x256xf32>
    %5 = vector.broadcast %4 : vector<1x256xf32> to vector<8x256xf32>
    %6 = arith.addf %3, %5 : vector<8x256xf32>
    %cst_5 = arith.constant 0.000000e+00 : f32
    %7 = vector.broadcast %cst_5 : f32 to vector<8x256xf32>
    %8 = arith.maximumf %6, %7 : vector<8x256xf32>
    %9 = arith.truncf %8 : vector<8x256xf32> to vector<8x256xbf16>
    %c0_6 = arith.constant 0 : index
    %c0_7 = arith.constant 0 : index
    %10 = vector.load %arg4[%c0_6, %c0_7] : memref<256x128xbf16, #tpu.memory_space<vmem>>, vector<256x128xbf16>
    %cst_8 = arith.constant dense<0.000000e+00> : vector<8x128xf32>
    %11 = tpu.matmul %9, %10, %cst_8 {dimension_numbers = #tpu.dot_dimension_numbers<[1], [0], [0], [1], [0, 0, 1, 1], [], []>} : vector<8x256xbf16>, vector<256x128xbf16>, vector<8x128xf32> -> vector<8x128xf32>
    %c0_9 = arith.constant 0 : index
    %c0_10 = arith.constant 0 : index
    %12 = vector.load %arg5[%c0_9, %c0_10] : memref<1x128xf32, #tpu.memory_space<vmem>>, vector<1x128xf32>
    %13 = vector.broadcast %12 : vector<1x128xf32> to vector<8x128xf32>
    %14 = arith.addf %11, %13 : vector<8x128xf32>
    %cst_11 = arith.constant 0.000000e+00 : f32
    %15 = vector.broadcast %cst_11 : f32 to vector<8x128xf32>
    %16 = arith.maximumf %14, %15 : vector<8x128xf32>
    %17 = arith.truncf %16 : vector<8x128xf32> to vector<8x128xbf16>
    %c0_12 = arith.constant 0 : index
    %c0_13 = arith.constant 0 : index
    %18 = vector.load %arg6[%c0_12, %c0_13] : memref<128x64xbf16, #tpu.memory_space<vmem>>, vector<128x64xbf16>
    %cst_14 = arith.constant dense<0.000000e+00> : vector<8x64xf32>
    %19 = tpu.matmul %17, %18, %cst_14 {dimension_numbers = #tpu.dot_dimension_numbers<[1], [0], [0], [1], [0, 0, 1, 1], [], []>} : vector<8x128xbf16>, vector<128x64xbf16>, vector<8x64xf32> -> vector<8x64xf32>
    %c0_15 = arith.constant 0 : index
    %c0_16 = arith.constant 0 : index
    %20 = vector.load %arg7[%c0_15, %c0_16] : memref<1x64xf32, #tpu.memory_space<vmem>>, vector<1x64xf32>
    %21 = vector.broadcast %20 : vector<1x64xf32> to vector<8x64xf32>
    %22 = arith.addf %19, %21 : vector<8x64xf32>
    %cst_17 = arith.constant 0.000000e+00 : f32
    %23 = vector.broadcast %cst_17 : f32 to vector<8x64xf32>
    %24 = arith.maximumf %22, %23 : vector<8x64xf32>
    %25 = arith.truncf %24 : vector<8x64xf32> to vector<8x64xbf16>
    %c0_18 = arith.constant 0 : index
    %c0_19 = arith.constant 0 : index
    %26 = vector.load %arg8[%c0_18, %c0_19] : memref<64x128xbf16, #tpu.memory_space<vmem>>, vector<64x128xbf16>
    %cst_20 = arith.constant dense<0.000000e+00> : vector<8x128xf32>
    %27 = tpu.matmul %25, %26, %cst_20 {dimension_numbers = #tpu.dot_dimension_numbers<[1], [0], [0], [1], [0, 0, 1, 1], [], []>} : vector<8x64xbf16>, vector<64x128xbf16>, vector<8x128xf32> -> vector<8x128xf32>
    %c0_21 = arith.constant 0 : index
    %c0_22 = arith.constant 0 : index
    %28 = vector.load %arg9[%c0_21, %c0_22] : memref<1x128xf32, #tpu.memory_space<vmem>>, vector<1x128xf32>
    %29 = vector.broadcast %28 : vector<1x128xf32> to vector<8x128xf32>
    %30 = arith.addf %27, %29 : vector<8x128xf32>
    %c0_23 = arith.constant 0 : index
    %c0_24 = arith.constant 0 : index
    %31 = vector.load %arg10[%c0_23, %c0_24] : memref<8x128xf32, #tpu.memory_space<vmem>>, vector<8x128xf32>
    tpu.vector_store %arg10[%c0_23, %c0_24], %30 {strides = array<i32>} : memref<8x128xf32, #tpu.memory_space<vmem>>, vector<8x128xf32>,
    return
  }
  func.func @transform_0(%arg0: i32) -> (i32, i32) {
    %c0_i32 = arith.constant 0 : i32
    %c0_i32_0 = arith.constant 0 : i32
    return %arg0, %c0_i32 : i32, i32
  }
  func.func @transform_1(%arg0: i32) -> (i32, i32) {
    %c0_i32 = arith.constant 0 : i32
    %c0_i32_0 = arith.constant 0 : i32
    %c0_i32_1 = arith.constant 0 : i32
    return %c0_i32, %c0_i32_0 : i32, i32
  }
  func.func @transform_2(%arg0: i32) -> (i32, i32) {
    %c0_i32 = arith.constant 0 : i32
    %c0_i32_0 = arith.constant 0 : i32
    %c0_i32_1 = arith.constant 0 : i32
    return %c0_i32, %c0_i32_0 : i32, i32
  }
  func.func @transform_3(%arg0: i32) -> (i32, i32) {
    %c0_i32 = arith.constant 0 : i32
    %c0_i32_0 = arith.constant 0 : i32
    %c0_i32_1 = arith.constant 0 : i32
    return %c0_i32, %c0_i32_0 : i32, i32
  }
  func.func @transform_4(%arg0: i32) -> (i32, i32) {
    %c0_i32 = arith.constant 0 : i32
    %c0_i32_0 = arith.constant 0 : i32
    %c0_i32_1 = arith.constant 0 : i32
    return %c0_i32, %c0_i32_0 : i32, i32
  }
  func.func @transform_5(%arg0: i32) -> (i32, i32) {
    %c0_i32 = arith.constant 0 : i32
    %c0_i32_0 = arith.constant 0 : i32
    %c0_i32_1 = arith.constant 0 : i32
    return %c0_i32, %c0_i32_0 : i32, i32
  }
  func.func @transform_6(%arg0: i32) -> (i32, i32) {
    %c0_i32 = arith.constant 0 : i32
    %c0_i32_0 = arith.constant 0 : i32
    %c0_i32_1 = arith.constant 0 : i32
    return %c0_i32, %c0_i32_0 : i32, i32
  }
  func.func @transform_7(%arg0: i32) -> (i32, i32) {
    %c0_i32 = arith.constant 0 : i32
    %c0_i32_0 = arith.constant 0 : i32
    %c0_i32_1 = arith.constant 0 : i32
    return %c0_i32, %c0_i32_0 : i32, i32
  }
  func.func @transform_8(%arg0: i32) -> (i32, i32) {
    %c0_i32 = arith.constant 0 : i32
    %c0_i32_0 = arith.constant 0 : i32
    %c0_i32_1 = arith.constant 0 : i32
    return %c0_i32, %c0_i32_0 : i32, i32
  }
  func.func @transform_9(%arg0: i32) -> (i32, i32) {
    %c0_i32 = arith.constant 0 : i32
    %c0_i32_0 = arith.constant 0 : i32
    return %arg0, %c0_i32 : i32, i32
  }
}

</mosaic_0001>

<bundles_post_ra>
// kernel: qnetwork_forward.1
= control target key start
LH: loop header
LB: loop body
LE: loop exit
PB: predicated region body
PF: predicated region fallthrough
CT: control target
= control target key end

     0   :  { %14 = vsyncpa [#allocation3], 0  ;;  %s1032_s0 = inlined_call_operand.vmem [shape: f32[8,8], index: 0, kind: input, shape index: {}]   ;;  %s1033_s1 = inlined_call_operand.hbm [shape: bf16[8,256], index: 1, kind: input, shape index: {}]   ;;  %s1034_s2 = inlined_call_operand.hbm [shape: f32[1,256], index: 2, kind: input, shape index: {}]   ;;  %s1035_s3 = inlined_call_operand.vmem [shape: bf16[256,128], index: 3, kind: input, shape index: {}]   ;;  %s1036_s4 = inlined_call_operand.vmem [shape: f32[1,128], index: 4, kind: input, shape index: {}]   ;;  %s1037_s5 = inlined_call_operand.vmem [shape: bf16[128,64], index: 5, kind: input, shape index: {}]   ;;  %s1038_s6 = inlined_call_operand.hbm [shape: f32[1,64], index: 6, kind: input, shape index: {}]   ;;  %s1039_s7 = inlined_call_operand.hbm [shape: bf16[64,128], index: 7, kind: input, shape index: {}]   ;;  %s1040_s8 = inlined_call_operand.hbm [shape: f32[1,128], index: 8, kind: input, shape index: {}]   ;;  %s1041_s9 = inlined_call_operand.vmem [shape: f32[8,128], index: 9, kind: output, shape index: {}]  }
   0x1   :  { %15 = vsyncpa [#allocation5], 0 }
   0x2   :  { %16 = vsyncpa [#allocation8], 0  ;;  %s810_s30 = smov [#allocation4]   ;;  %s811_s11 = smov [#allocation7]  }
   0x3   :  { %s35_s10 = sshll.u32 %s810_s30, 4  ;;  %s60_s12 = sshll.u32 %s811_s11, 4  ;;  %s36_s10 = int_to_ptr.vmem [resolvable:$true] %s35_s10  ;;  %s870_s12 = int_to_ptr.vmem [resolvable:$true] %s60_s12 }
   0x4   :  { %s694_s15 = scalar_lea.hbm %s1034_s2, 32 }
   0x5   :  { %p695_p0 = scmp.ne.s32.totalorder %s1034_s2, %s694_s15  ;;  %p698_p1 = scmp.lt.u32.totalorder %s694_s15, %s1034_s2 }
   0x7   :  { %p700_p2 = pnand %p698_p1, %p695_p0 }
   0x9   :  { %703 = shalt.err (!%p700_p2)
}
   0xa   :  { %s704_s20 = scalar_lea.vmem %s36_s10, 32  ;;  %p709_p4 = scmp.lt.s32.totalorder %s36_s10, %s36_s10 }
   0xb   :  { %p705_p3 = scmp.ne.s32.totalorder %s36_s10, %s704_s20  ;;  %p710_p5 = scmp.lt.s32.totalorder %s704_s20, %s704_s20 }
   0xd   :  { %p711_p6 = por %p710_p5, %p709_p4 }
   0xf   :  { %p712_p7 = pnand %p711_p6, %p705_p3 }
  0x11   :  { %715 = shalt.err (!%p712_p7)
}
  0x12   :  { %38 = dma.hbm_to_vmem [thread:$0]  %s1034_s2, 32, %s36_s10, [#allocation5]  }
  0x13   :  { %s716_s25 = scalar_lea.hbm %s1039_s7, 512 }
  0x14   :  { %p717_p8 = scmp.ne.s32.totalorder %s1039_s7, %s716_s25  ;;  %p720_p9 = scmp.lt.u32.totalorder %s716_s25, %s1039_s7 }
  0x16   :  { %p722_p10 = pnand %p720_p9, %p717_p8 }
  0x18   :  { %725 = shalt.err (!%p722_p10)
}
  0x19   :  { %s726_s30 = scalar_lea.vmem %s870_s12, 512  ;;  %p731_p12 = scmp.lt.s32.totalorder %s870_s12, %s870_s12 }
  0x1a   :  { %p727_p11 = scmp.ne.s32.totalorder %s870_s12, %s726_s30  ;;  %p732_p13 = scmp.lt.s32.totalorder %s726_s30, %s726_s30 }
  0x1c   :  { %p733_p0 = por %p732_p13, %p731_p12 }
  0x1e   :  { %p734_p1 = pnand %p733_p0, %p727_p11 }
  0x20   :  { %737 = shalt.err (!%p734_p1)
}
  0x21   :  { %s812_s2 = smov 64   ;;  %s813_s10 = smov 4  }
  0x22   :  { %66 = dma.hbm_to_vmem [thread:$0]  %s1039_s7, 512, %s870_s12, [#allocation8], %s812_s2, %s812_s2, %s813_s10  }
  0x23   :  { %s814_s14 = smov [#allocation2]   ;;  %s815_s16 = smov [#allocation6]  }
  0x24   :  { %s25_s15 = sshll.u32 %s814_s14, 4  ;;  %s51_s17 = sshll.u32 %s815_s16, 4  ;;  %s26_s15 = int_to_ptr.vmem [resolvable:$true] %s25_s15  ;;  %s52_s17 = int_to_ptr.vmem [resolvable:$true] %s51_s17 }
  0x25   :  { %s738_s20 = scalar_lea.hbm %s1033_s1, 128 }
  0x26   :  { %p739_p2 = scmp.ne.s32.totalorder %s1033_s1, %s738_s20  ;;  %p742_p3 = scmp.lt.u32.totalorder %s738_s20, %s1033_s1 }
  0x28   :  { %p744_p4 = pnand %p742_p3, %p739_p2 }
  0x2a   :  { %747 = shalt.err (!%p744_p4)
}
  0x2b   :  { %s748_s7 = scalar_lea.vmem %s26_s15, 128  ;;  %p753_p6 = scmp.lt.s32.totalorder %s26_s15, %s26_s15 }
  0x2c   :  { %p749_p5 = scmp.ne.s32.totalorder %s26_s15, %s748_s7  ;;  %p754_p7 = scmp.lt.s32.totalorder %s748_s7, %s748_s7 }
  0x2e   :  { %p755_p8 = por %p754_p7, %p753_p6 }
  0x30   :  { %p756_p9 = pnand %p755_p8, %p749_p5 }
  0x32   :  { %759 = shalt.err (!%p756_p9)
}
  0x33   :  { %28 = dma.hbm_to_vmem [thread:$0]  %s1033_s1, 128, %s26_s15, [#allocation3]  }
  0x34   :  { %s760_s28 = scalar_lea.hbm %s1038_s6, 16 }
  0x35   :  { %p761_p10 = scmp.ne.s32.totalorder %s1038_s6, %s760_s28  ;;  %p764_p11 = scmp.lt.u32.totalorder %s760_s28, %s1038_s6 }
  0x37   :  { %p766_p12 = pnand %p764_p11, %p761_p10 }
  0x39   :  { %769 = shalt.err (!%p766_p12)
}
  0x3a   :  { %s770_s11 = scalar_lea.vmem %s52_s17, 16  ;;  %s774_s13 = scalar_lea.vmem %s52_s17, 32 }
  0x3b   :  { %p771_p13 = scmp.ne.s32.totalorder %s52_s17, %s770_s11  ;;  %p775_p0 = scmp.lt.s32.totalorder %s52_s17, %s52_s17 }
  0x3c   :  { %p776_p1 = scmp.lt.s32.totalorder %s774_s13, %s770_s11 }
  0x3e   :  { %p777_p2 = por %p776_p1, %p775_p0 }
  0x40   :  { %p778_p3 = pnand %p777_p2, %p771_p13 }
  0x42   :  { %781 = shalt.err (!%p778_p3)
}
  0x43   :  { %54 = dma.hbm_to_vmem [thread:$0]  %s1038_s6, 16, %s52_s17, [#allocation5]  }
  0x44   :  { %s816_s15 = smov [#allocation9]   ;;  %s782_s20 = scalar_lea.hbm %s1040_s8, 16 }
  0x45   :  { %s73_s16 = sshll.u32 %s816_s15, 4  ;;  %p783_p4 = scmp.ne.s32.totalorder %s1040_s8, %s782_s20  ;;  %s74_s16 = int_to_ptr.vmem [resolvable:$true] %s73_s16 }
  0x46   :  { %p786_p5 = scmp.lt.u32.totalorder %s782_s20, %s1040_s8 }
  0x48   :  { %p788_p6 = pnand %p786_p5, %p783_p4 }
  0x4a   :  { %791 = shalt.err (!%p788_p6)
}
  0x4b   :  { %s792_s7 = scalar_lea.vmem %s74_s16, 16  ;;  %s796_s6 = scalar_lea.vmem %s74_s16, 32 }
  0x4c   :  { %p793_p7 = scmp.ne.s32.totalorder %s74_s16, %s792_s7  ;;  %p797_p8 = scmp.lt.s32.totalorder %s74_s16, %s74_s16 }
  0x4d   :  { %p798_p9 = scmp.lt.s32.totalorder %s796_s6, %s792_s7 }
  0x4f   :  { %p799_p10 = por %p798_p9, %p797_p8 }
  0x51   :  { %p800_p11 = pnand %p799_p10, %p793_p7 }
  0x53   :  { %803 = shalt.err (!%p800_p11)
}
  0x54   :  { %76 = dma.hbm_to_vmem [thread:$0]  %s1040_s8, 16, %s74_s16, [#allocation8]  }
  0x55   :  { %804 = dma.done.wait [#allocation3], 128  }
  0x56   :  { %805 = vsyncadd [#allocation3], 4294967168 }
  0x57   :  { %806 = dma.done.wait [#allocation5], 48  }
  0x58   :  { %807 = vsyncadd [#allocation5], 4294967248 }
  0x59   :  { %808 = dma.done.wait [#allocation8], 528  }
  0x5a   :  { %809 = vsyncadd [#allocation8], 4294966768  ;;  %v817_v0 = vmov 0   ;;  %v95_v1 = vld [vmem:[#allocation2] sm:$0xff]  ;;  %vm117_vm0 = vcmask 1043456   ;;  %v668_v9 = vld [vmem:[%s1035_s3 + $0x48] sm:$0xff]   ;;  %v98_v30 = vlaneseq }
  0x5b   :  { %156 = vmatprep.mubr.bf16.mxu0 %v817_v0  ;;  %v93_v2 = vld [vmem:[%s1032_s0] sm:$0xff]  ;;  %v551_v3 = vcombine.high %v95_v1, %v95_v1  ;;  %v550_v4 = vcombine.low %v95_v1, %v95_v1  ;;  %vm113_vm1 = vcmask 64512   ;;  %v669_v10 = vld [vmem:[%s1035_s3 + $0x8] sm:$0xff]   ;;  %v670_v11 = vld [vmem:[%s1035_s3 + $0x50] sm:$0xff]   ;;  %v818_v24 = vmov 0.0  }
  0x5c   :  { %v666_v5 = vld [vmem:[%s1035_s3 + $0x40] sm:$0xff]   ;;  %v94_v8 = vpack.c.bf16 %v93_v2, %v93_v2  ;;  %v671_v12 = vld [vmem:[%s1035_s3 + $0x10] sm:$0xff]   ;;  %v672_v13 = vld [vmem:[%s1035_s3 + $0x58] sm:$0xff]   ;;  %v99_v31 = vshrl.u32 %v98_v30, 7  ;;  %vm819_vm2 = vmmov 0   ;;  %vm498_vm3 = vcmask 523264  }
  0x5d   :  { %v667_v6 = vld [vmem:[%s1035_s3] sm:$0xff]   ;;  %552 = vmatprep.subr.msk.bf16.mxu0 %vm117_vm0, %v551_v3  ;;  %v119_v7 = vsel %vm117_vm0, %v550_v4, 0  ;;  %586 = vmatprep.subr.bf16.mxu1 %v666_v5  ;;  %v673_v14 = vld [vmem:[%s1035_s3 + $0x18] sm:$0xff]   ;;  %v676_v17 = vld [vmem:[%s1035_s3 + $0x68] sm:$0xff]  }
  0x5e   :  { %125 = vmatpush1.bf16.msra.mxu0 %v119_v7  ;;  %587 = vmatpush3.bf16.msra.mxu1 %v667_v6  ;;  %v674_v15 = vld [vmem:[%s1035_s3 + $0x60] sm:$0xff]   ;;  %v677_v18 = vld [vmem:[%s1035_s3 + $0x28] sm:$0xff]   ;;  %v678_v19 = vld [vmem:[%s1035_s3 + $0x70] sm:$0xff]   ;;  %v100_v32 = vsub.s32 0, %v99_v31  ;;  %v104_v34 = vsub.s32 1, %v99_v31 }
  0x5f   :  { %588 = vmatprep.subr.bf16.mxu1 %v668_v9  ;;  %v675_v16 = vld [vmem:[%s1035_s3 + $0x20] sm:$0xff]   ;;  %v679_v20 = vld [vmem:[%s1035_s3 + $0x30] sm:$0xff]   ;;  %v680_v21 = vld [vmem:[%s1035_s3 + $0x78] sm:$0xff]   ;;  %622 = vmatprep.subr.bf16.mxu0 %v818_v24 }
  0x60   :  { %v681_v22 = vld [vmem:[%s1035_s3 + $0x38] sm:$0xff]   ;;  %v682_v23 = vld [vmem:[%s1037_s5] sm:$0xff]   ;;  %v683_v25 = vld [vmem:[%s1037_s5 + $0x8] sm:$0xff]  }
  0x61   :  { %553 = vmatmul.mubr.msk.bf16.vlgmr.msra.gmra.mrb[0].mxu0 %vm113_vm1, %v94_v8  ;;  %v684_v26 = vld [vmem:[%s1037_s5 + $0x10] sm:$0xff]   ;;  %v685_v27 = vld [vmem:[%s1037_s5 + $0x18] sm:$0xff]   ;;  %v686_v28 = vld [vmem:[%s1037_s5 + $0x20] sm:$0xff]  }
  0x62   :  { %589 = vmatpush3.bf16.msra.mxu1 %v669_v10  ;;  %623 = vmatpush3.bf16.msra.mxu0 %v682_v23  ;;  %v687_v29 = vld [vmem:[%s1037_s5 + $0x28] sm:$0xff]   ;;  %v688_v47 = vld [vmem:[%s1037_s5 + $0x30] sm:$0xff]   ;;  %v689_v48 = vld [vmem:[%s1037_s5 + $0x38] sm:$0xff]  }
  0x63   :  { %590 = vmatprep.subr.bf16.mxu1 %v670_v11  ;;  %624 = vmatprep.subr.bf16.mxu0 %v818_v24  ;;  %v96_v33 = vld [vmem:[#allocation4] sm:$0x3]  ;;  %v690_v49 = vld [vmem:[#allocation7] sm:$0xff]   ;;  %v691_v50 = vld [vmem:[#allocation7 + $0x8] sm:$0xff]  }
  0x64   :  { %v101_v35 = vrot.slane %v96_v33, %v100_v32  ;;  %v105_v36 = vrot.slane %v96_v33, %v104_v34  ;;  %638 = vmatprep.mubr.msk.bf16.mxu0 %vm819_vm2, %v818_v24  ;;  %v554_v52 = vld [vmem:[%s1036_s4] ss:$0 sm:$0xff]  ;;  %v693_v61 = vld [vmem:[#allocation7 + $0x18] sm:$0xff]   ;;  %v580_v6 = vld [vmem:[#allocation9] ss:$0 sm:$0xff] }
  0x65   :  { %v692_v60 = vld [vmem:[#allocation7 + $0x10] sm:$0xff]   ;;  %v571_v62 = vld [vmem:[#allocation6] ss:$0 sm:$0xff] }
  0x66   :  { %591 = vmatpush3.bf16.msra.mxu1 %v671_v12  ;;  %625 = vmatpush3.bf16.msra.mxu0 %v683_v25 }
  0x67   :  { %592 = vmatprep.subr.bf16.mxu1 %v672_v13  ;;  %626 = vmatprep.subr.bf16.mxu0 %v818_v24 }
  0x6a   :  { %593 = vmatpush3.bf16.msra.mxu1 %v673_v14  ;;  %627 = vmatpush3.bf16.msra.mxu0 %v684_v26 }
  0x6b   :  { %594 = vmatprep.subr.bf16.mxu1 %v674_v15  ;;  %628 = vmatprep.subr.bf16.mxu0 %v818_v24 }
  0x6e   :  { %595 = vmatpush3.bf16.msra.mxu1 %v675_v16  ;;  %629 = vmatpush3.bf16.msra.mxu0 %v685_v27 }
  0x6f   :  { %596 = vmatprep.subr.bf16.mxu1 %v676_v17  ;;  %630 = vmatprep.subr.bf16.mxu0 %v818_v24 }
  0x72   :  { %597 = vmatpush3.bf16.msra.mxu1 %v677_v18  ;;  %631 = vmatpush3.bf16.msra.mxu0 %v686_v28 }
  0x73   :  { %598 = vmatprep.subr.bf16.mxu1 %v678_v19  ;;  %632 = vmatprep.subr.bf16.mxu0 %v818_v24 }
  0x76   :  { %599 = vmatpush3.bf16.msra.mxu1 %v679_v20  ;;  %633 = vmatpush3.bf16.msra.mxu0 %v687_v29 }
  0x77   :  { %600 = vmatprep.subr.bf16.mxu1 %v680_v21  ;;  %634 = vmatprep.subr.bf16.mxu0 %v818_v24 }
  0x7a   :  { %601 = vmatpush3.bf16.msra.mxu1 %v681_v22  ;;  %635 = vmatpush3.bf16.msra.mxu0 %v688_v47 }
  0x7b   :  { %642 = vmatprep.subr.bf16.mxu1 %v818_v24  ;;  %636 = vmatprep.subr.bf16.mxu0 %v818_v24 }
  0x7e   :  { %637 = vmatpush3.bf16.msra.mxu0 %v689_v48 }
 0x134   :  { %v158_v37 = vpop.f32.mrb[0].mxu0 }
 0x135   :  { %v159_v38 = vadd.f32 %v158_v37, %v101_v35  ;;  %v160_v39 = vpop.f32.mrb[1].mxu0 }
 0x136   :  { %v161_v40 = vadd.f32 %v160_v39, %v105_v36  ;;  %v162_v41 = vpop.f32.mrb[2].mxu0 }
 0x137   :  { %v165_v42 = vmax.f32 %v159_v38, 0.0  ;;  %v163_v43 = vpop.f32.mrb[3].mxu0 }
 0x138   :  { %v166_v44 = vmax.f32 %v161_v40, 0.0 }
 0x139   :  { %v167_v46 = vpack.c.bf16 %v165_v42, %v165_v42 }
 0x13a   :  { %v168_v45 = vpack.c.bf16 %v166_v44, %v166_v44 }
 0x13c   :  { %336 = vmatprep.mubr.bf16.mxu1 %v168_v45 }
 0x13d   :  { %337 = vmatmul.mubr.bf16.vlgmr.msra.gmra.mrb[0].mxu1 %v167_v46 }
 0x13e   :  { %650 = vmatprep.mubr.msk.bf16.mxu1 %vm819_vm2, %v818_v24  ;;  %643 = vmatpush3.bf16.msra.mxu1 %v690_v49 }
 0x13f   :  { %644 = vmatprep.subr.bf16.mxu1 %v818_v24 }
 0x142   :  { %645 = vmatpush3.bf16.msra.mxu1 %v691_v50 }
 0x143   :  { %646 = vmatprep.subr.bf16.mxu1 %v818_v24 }
 0x146   :  { %647 = vmatpush3.bf16.msra.mxu1 %v692_v60 }
 0x147   :  { %648 = vmatprep.subr.bf16.mxu1 %v818_v24 }
 0x14a   :  { %649 = vmatpush3.bf16.msra.mxu1 %v693_v61 }
 0x210   :  { %v602_v51 = vpop.f32.mrb[0].mxu1 }
 0x211   :  { %v603_v53 = vpop.f32.mrb[1].mxu1 }
 0x212   :  { %v604_v54 = vadd.f32 %v603_v53, %v602_v51  ;;  %v605_v55 = vpop.f32.mrb[2].mxu1 }
 0x213   :  { %v606_v56 = vpop.f32.mrb[3].mxu1 }
 0x214   :  { %v339_v57 = vadd.f32 %v604_v54, %v554_v52 }
 0x216   :  { %v344_v58 = vmax.f32 %v339_v57, 0.0 }
 0x218   :  { %v345_v59 = vpack.c.bf16 %v344_v58, %v344_v58 }
 0x21a   :  { %639 = vmatmul.mubr.bf16.vlgmr.msra.gmra.mrb[4].mxu0 %v345_v59 }
 0x2ed   :  { %v451_v63 = vpop.f32.mrb[4].mxu0 }
 0x2ee   :  { %v452_v0 = vadd.f32 %v571_v62, %v451_v63  ;;  %v640_v1 = vpop.f32.mrb[5].mxu0 }
 0x2ef   :  { %v454_v2 = vpop.f32.mrb[6].mxu0 }
 0x2f0   :  { %v457_v3 = vmax.f32 %v452_v0, 0.0  ;;  %v641_v4 = vpop.f32.mrb[7].mxu0 }
 0x2f2   :  { %v458_v5 = vpack.c.bf16 %v457_v3, %v457_v3 }
 0x2f4   :  { %651 = vmatmul.mubr.msk.bf16.vlgmr.msra.gmra.mrb[4].mxu1 %vm498_vm3, %v458_v5 }
 0x3c7   :  { %v536_v7 = vpop.f32.mrb[4].mxu1 }
 0x3c8   :  { %v537_v8 = vadd.f32 %v580_v6, %v536_v7  ;;  %v652_v9 = vpop.f32.mrb[5].mxu1 }
 0x3c9   :  { %v539_v10 = vpop.f32.mrb[6].mxu1 }
 0x3ca   :  { %542 = vst [vmem:[%s1041_s9] sm:$0xff] %v537_v8  ;;  %v653_v11 = vpop.f32.mrb[7].mxu1 }
 0x3cb   :  { %547 = vsyncpa [#allocation3], 1 }
 0x3cc   :  { %548 = vsyncpa [#allocation5], 1 }
 0x3cd   :  { %549 = vsyncpa [#allocation8], 1 }

</bundles_post_ra>
